<compile_context>
chip_gen: v6e
topology: v6e:2x2x1
jax: 0.10.0
libtpu: 0.0.40
codegen_flags: <defaults>
</compile_context>

<pallas_src>
import functools

import jax
import jax.numpy as jnp
from jax.experimental import pallas as pl
from jax.experimental.pallas import tpu as pltpu

_EPS = 1e-5
_VMEM_LIMIT = 32 * 1024 * 1024          # scoped VMEM requested from Mosaic
_FUSED_VMEM_BUDGET = 26 * 1024 * 1024   # conservative working-set budget


# ---------------------------------------------------------------------------
# Fused single-pass kernel: stats + normalize + ReLU on a VMEM-resident
# (N, tc, L) channel slab.  HBM traffic: 1 read + 1 write of x.
# ---------------------------------------------------------------------------
def _fused_kernel(x_ref, g_ref, b_ref, o_ref, *, inv_m):
    xt = x_ref[...].astype(jnp.float32)                            # (n, tc, l)
    # Per-channel sums: lane reduce (XLU) then cheap leading-dim adds (VPU).
    s = jnp.sum(jnp.sum(xt, axis=2, keepdims=True), axis=0)        # (tc, 1)
    ss = jnp.sum(jnp.sum(xt * xt, axis=2, keepdims=True), axis=0)  # (tc, 1)
    mean = s * jnp.float32(inv_m)
    var = jnp.maximum(ss * jnp.float32(inv_m) - mean * mean, 0.0)
    rstd = jax.lax.rsqrt(var + jnp.float32(_EPS))
    scale = g_ref[...] * rstd                                      # (tc, 1)
    shift = b_ref[...] - mean * scale                               # (tc, 1)
    y = xt * scale[jnp.newaxis] + shift[jnp.newaxis]                # (n, tc, l)
    o_ref[...] = jnp.maximum(y, 0.0).astype(o_ref.dtype)


def _fused_channel_tile(n, c, l, itemsize, max_fused_tc=None):
    """Largest legal channel tile whose fused working set fits in VMEM.

    Legal channel tiles: divisors of C that are multiples of 8, or C itself
    (full-dim blocks are always layout-legal).  Working set per element ~=
    double-buffered in/out refs plus a few f32 temporaries in the body.
    Returns None if even the smallest legal tile does not fit.
    """
    bytes_per_elem = 4 * itemsize + 12
    cands = sorted({c} | {t for t in range(8, c, 8) if c % t == 0})
    if max_fused_tc is not None:
        cands = [t for t in cands if t <= max_fused_tc]
    best = None
    for t in cands:
        if n * t * l * bytes_per_elem <= _FUSED_VMEM_BUDGET:
            best = t
    return best


def _norm_act_fused(x, g2d, b2d, tc):
    n, c, l = x.shape
    inv_m = 1.0 / float(n * l)
    kernel = functools.partial(_fused_kernel, inv_m=inv_m)
    return pl.pallas_call(
        kernel,
        out_shape=jax.ShapeDtypeStruct((n, c, l), x.dtype),
        grid_spec=pltpu.PrefetchScalarGridSpec(
            num_scalar_prefetch=0,
            grid=(c // tc,),
            in_specs=[
                pl.BlockSpec((n, tc, l), lambda ci: (0, ci, 0)),
                pl.BlockSpec((tc, 1), lambda ci: (ci, 0)),
                pl.BlockSpec((tc, 1), lambda ci: (ci, 0)),
            ],
            out_specs=pl.BlockSpec((n, tc, l), lambda ci: (0, ci, 0)),
        ),
        compiler_params=pltpu.CompilerParams(
            dimension_semantics=("parallel",),
            vmem_limit_bytes=_VMEM_LIMIT),
    )(x, g2d, b2d)


# ---------------------------------------------------------------------------
# Two-pass fallback (used when a full (N, tc, L) slab can't fit in VMEM).
# ---------------------------------------------------------------------------
def _pick_tile(dim, max_tile, align):
    """Largest tile <= max_tile that evenly divides `dim`, preferring
    `align`-aligned sizes; falls back to the full dim (always legal)."""
    if dim <= max_tile:
        return dim
    t = (max_tile // align) * align
    while t >= align:
        if dim % t == 0:
            return t
        t -= align
    return dim


def _norm_act_two_pass(x, g2d, b2d, *, max_tc=64, max_tl=4096):
    n, c, l = x.shape
    tc = _pick_tile(c, max_tc, 8)
    tl = _pick_tile(l, max_tl, 128)
    c_blocks = c // tc
    l_blocks = l // tl
    inv_m = 1.0 / float(n * l)

    # -------- pass 1: per-channel stats -> folded (scale, shift) ----------
    def stats_kernel(x_ref, g_ref, bta_ref, scale_ref, shift_ref,
                     sum_ref, sumsq_ref):
        ni = pl.program_id(1)
        li = pl.program_id(2)

        @pl.when(jnp.logical_and(ni == 0, li == 0))
        def _():
            sum_ref[...] = jnp.zeros_like(sum_ref)
            sumsq_ref[...] = jnp.zeros_like(sumsq_ref)

        xt = x_ref[...].astype(jnp.float32)                       # (tc, tl)
        sum_ref[...] += jnp.sum(xt, axis=-1, keepdims=True)
        sumsq_ref[...] += jnp.sum(xt * xt, axis=-1, keepdims=True)

        @pl.when(jnp.logical_and(ni == pl.num_programs(1) - 1,
                                 li == pl.num_programs(2) - 1))
        def _():
            mean = sum_ref[...] * jnp.float32(inv_m)
            var = jnp.maximum(
                sumsq_ref[...] * jnp.float32(inv_m) - mean * mean, 0.0)
            rstd = jax.lax.rsqrt(var + jnp.float32(_EPS))
            scale = g_ref[...] * rstd
            scale_ref[...] = scale
            shift_ref[...] = bta_ref[...] - mean * scale

    scale, shift = pl.pallas_call(
        stats_kernel,
        out_shape=(jax.ShapeDtypeStruct((c, 1), jnp.float32),
                   jax.ShapeDtypeStruct((c, 1), jnp.float32)),
        grid_spec=pltpu.PrefetchScalarGridSpec(
            num_scalar_prefetch=0,
            grid=(c_blocks, n, l_blocks),
            in_specs=[
                pl.BlockSpec((None, tc, tl), lambda ci, ni, li: (ni, ci, li)),
                pl.BlockSpec((tc, 1), lambda ci, ni, li: (ci, 0)),
                pl.BlockSpec((tc, 1), lambda ci, ni, li: (ci, 0)),
            ],
            out_specs=(
                pl.BlockSpec((tc, 1), lambda ci, ni, li: (ci, 0)),
                pl.BlockSpec((tc, 1), lambda ci, ni, li: (ci, 0)),
            ),
            scratch_shapes=[pltpu.VMEM((tc, 1), jnp.float32),
                            pltpu.VMEM((tc, 1), jnp.float32)],
        ),
        compiler_params=pltpu.CompilerParams(
            dimension_semantics=("parallel", "arbitrary", "arbitrary"),
            vmem_limit_bytes=_VMEM_LIMIT),
    )(x, g2d, b2d)

    # -------- pass 2: normalize + ReLU, fully parallel ---------------------
    def norm_kernel(x_ref, scale_ref, shift_ref, o_ref):
        xt = x_ref[...].astype(jnp.float32)                       # (tc, tl)
        y = xt * scale_ref[...] + shift_ref[...]
        o_ref[...] = jnp.maximum(y, 0.0).astype(o_ref.dtype)

    out = pl.pallas_call(
        norm_kernel,
        out_shape=jax.ShapeDtypeStruct((n, c, l), x.dtype),
        grid_spec=pltpu.PrefetchScalarGridSpec(
            num_scalar_prefetch=0,
            grid=(n, c_blocks, l_blocks),
            in_specs=[
                pl.BlockSpec((None, tc, tl), lambda ni, ci, li: (ni, ci, li)),
                pl.BlockSpec((tc, 1), lambda ni, ci, li: (ci, 0)),
                pl.BlockSpec((tc, 1), lambda ni, ci, li: (ci, 0)),
            ],
            out_specs=pl.BlockSpec((None, tc, tl),
                                   lambda ni, ci, li: (ni, ci, li)),
        ),
        compiler_params=pltpu.CompilerParams(
            dimension_semantics=("parallel", "parallel", "parallel"),
            vmem_limit_bytes=_VMEM_LIMIT),
    )(x, scale, shift)

    return out


# ---------------------------------------------------------------------------
# Public wrapper.
# ---------------------------------------------------------------------------
def norm_act(x, gamma, beta, *, force_two_pass=False, max_fused_tc=None,
             max_tc=64, max_tl=4096):
    """BatchNorm1d (training-mode batch stats) + ReLU.

    x: (N, C, L) or (N, C). gamma, beta: (C,). Returns same shape as x.
    """
    squeeze = False
    if x.ndim == 2:
        x = x[:, :, None]
        squeeze = True
    n, c, l = x.shape
    g2d = gamma.reshape(c, 1).astype(jnp.float32)
    b2d = beta.reshape(c, 1).astype(jnp.float32)

    tc_fused = None
    if not force_two_pass:
        tc_fused = _fused_channel_tile(n, c, l, jnp.dtype(x.dtype).itemsize,
                                       max_fused_tc)
    if tc_fused is not None:
        out = _norm_act_fused(x, g2d, b2d, tc_fused)
    else:
        out = _norm_act_two_pass(x, g2d, b2d, max_tc=max_tc, max_tl=max_tl)

    if squeeze:
        out = out[:, :, 0]
    return out


# ---------------------------------------------------------------------------
# Reference + tests.
# ---------------------------------------------------------------------------
def _reference(x, gamma, beta):
    mean = jnp.mean(x, axis=(0, 2), keepdims=True)
    var = jnp.mean((x - mean) ** 2, axis=(0, 2), keepdims=True)
    y = (x - mean) / jnp.sqrt(var + _EPS)
    y = y * gamma.reshape(1, -1, 1) + beta.reshape(1, -1, 1)
    return jnp.maximum(y, 0.0)


if __name__ == "__main__":
    key = jax.random.PRNGKey(0)
    k1, k2 = jax.random.split(key)

    # Test 1: tiny shape matching the module spec (N=2, C=4, L=16), fused path.
    N, C, L = 2, 4, 16
    x = jax.random.normal(k1, (N, C, L), dtype=jnp.float32)
    gamma = 1.0 + 0.1 * jnp.arange(C, dtype=jnp.float32)
    beta = 0.05 * jnp.arange(C, dtype=jnp.float32)

    out = jax.block_until_ready(norm_act(x, gamma, beta))
    ref = _reference(x, gamma, beta)
    assert out.shape == (N, C, L)
    assert jnp.allclose(out, ref, atol=2e-5, rtol=1e-5)

    # Test 2: fused path with a multi-block channel grid (C=16 -> 2 blocks of
    # 8 channels, lane-dense 256-wide tiles).
    N2, C2, L2 = 3, 16, 256
    x2 = jax.random.normal(k2, (N2, C2, L2), dtype=jnp.float32) * 2.0 + 0.5
    gamma2 = 1.0 + 0.05 * jnp.arange(C2, dtype=jnp.float32)
    beta2 = -0.02 * jnp.arange(C2, dtype=jnp.float32)

    out2 = jax.block_until_ready(norm_act(x2, gamma2, beta2, max_fused_tc=8))
    ref2 = _reference(x2, gamma2, beta2)
    assert out2.shape == (N2, C2, L2)
    assert jnp.allclose(out2, ref2, atol=2e-5, rtol=1e-5)

    # Test 3: force the two-pass fallback with multi-block grids so the
    # accumulator / layout paths used at very large (N*L) sizes are covered.
    out3 = jax.block_until_ready(
        norm_act(x2, gamma2, beta2, force_two_pass=True, max_tc=8, max_tl=128))
    assert out3.shape == (N2, C2, L2)
    assert jnp.allclose(out3, ref2, atol=2e-5, rtol=1e-5)

    print("KERNEL_OK")
</pallas_src>

<mosaic_0001>
module attributes {stable_mosaic.version = 11 : i64} {
  func.func @_fused_kernel(%arg0: i32, %arg1: memref<2x4x16xf32, #tpu.memory_space<vmem>>, %arg2: memref<4x1xf32, #tpu.memory_space<vmem>>, %arg3: memref<4x1xf32, #tpu.memory_space<vmem>>, %arg4: memref<2x4x16xf32, #tpu.memory_space<vmem>>) attributes {dimension_semantics = [#tpu.dimension_semantics<parallel>], iteration_bounds = array<i64: 1>, scalar_prefetch = 0 : i64, scratch_operands = 0 : i64, tpu.core_type = #tpu.core_type<tc>, window_params = [{transform_indices = @transform_0, window_bounds = array<i64: 2, 4, 16>}, {transform_indices = @transform_1, window_bounds = array<i64: 4, 1>}, {transform_indices = @transform_2, window_bounds = array<i64: 4, 1>}, {transform_indices = @transform_3, window_bounds = array<i64: 2, 4, 16>}]} {
    %c0 = arith.constant 0 : index
    %c0_0 = arith.constant 0 : index
    %c0_1 = arith.constant 0 : index
    %0 = vector.load %arg1[%c0, %c0_0, %c0_1] : memref<2x4x16xf32, #tpu.memory_space<vmem>>, vector<2x4x16xf32>
    %cst = arith.constant dense<0.000000e+00> : vector<2x4xf32>
    %1 = vector.multi_reduction <add>, %0, %cst [2] : vector<2x4x16xf32> to vector<2x4xf32>
    %2 = vector.shape_cast %1 : vector<2x4xf32> to vector<2x4x1xf32>
    %cst_2 = arith.constant dense<0.000000e+00> : vector<4x1xf32>
    %3 = vector.multi_reduction <add>, %2, %cst_2 [0] : vector<2x4x1xf32> to vector<4x1xf32>
    %4 = arith.mulf %0, %0 : vector<2x4x16xf32>
    %cst_3 = arith.constant dense<0.000000e+00> : vector<2x4xf32>
    %5 = vector.multi_reduction <add>, %4, %cst_3 [2] : vector<2x4x16xf32> to vector<2x4xf32>
    %6 = vector.shape_cast %5 : vector<2x4xf32> to vector<2x4x1xf32>
    %cst_4 = arith.constant dense<0.000000e+00> : vector<4x1xf32>
    %7 = vector.multi_reduction <add>, %6, %cst_4 [0] : vector<2x4x1xf32> to vector<4x1xf32>
    %cst_5 = arith.constant 3.125000e-02 : f32
    %8 = vector.broadcast %cst_5 : f32 to vector<4x1xf32>
    %9 = arith.mulf %3, %8 : vector<4x1xf32>
    %cst_6 = arith.constant 3.125000e-02 : f32
    %10 = vector.broadcast %cst_6 : f32 to vector<4x1xf32>
    %11 = arith.mulf %7, %10 : vector<4x1xf32>
    %12 = arith.mulf %9, %9 : vector<4x1xf32>
    %13 = arith.subf %11, %12 : vector<4x1xf32>
    %cst_7 = arith.constant 0.000000e+00 : f32
    %14 = vector.broadcast %cst_7 : f32 to vector<4x1xf32>
    %15 = arith.maximumf %13, %14 : vector<4x1xf32>
    %cst_8 = arith.constant 9.99999974E-6 : f32
    %16 = vector.broadcast %cst_8 : f32 to vector<4x1xf32>
    %17 = arith.addf %15, %16 : vector<4x1xf32>
    %18 = math.rsqrt %17 : vector<4x1xf32>
    %c0_9 = arith.constant 0 : index
    %c0_10 = arith.constant 0 : index
    %19 = vector.load %arg2[%c0_9, %c0_10] : memref<4x1xf32, #tpu.memory_space<vmem>>, vector<4x1xf32>
    %20 = arith.mulf %19, %18 : vector<4x1xf32>
    %c0_11 = arith.constant 0 : index
    %c0_12 = arith.constant 0 : index
    %21 = vector.load %arg3[%c0_11, %c0_12] : memref<4x1xf32, #tpu.memory_space<vmem>>, vector<4x1xf32>
    %22 = arith.mulf %9, %20 : vector<4x1xf32>
    %23 = arith.subf %21, %22 : vector<4x1xf32>
    %24 = vector.shape_cast %20 : vector<4x1xf32> to vector<1x4x1xf32>
    %25 = vector.broadcast %24 : vector<1x4x1xf32> to vector<2x4x16xf32>
    %26 = arith.mulf %0, %25 : vector<2x4x16xf32>
    %27 = vector.shape_cast %23 : vector<4x1xf32> to vector<1x4x1xf32>
    %28 = vector.broadcast %27 : vector<1x4x1xf32> to vector<2x4x16xf32>
    %29 = arith.addf %26, %28 : vector<2x4x16xf32>
    %cst_13 = arith.constant 0.000000e+00 : f32
    %30 = vector.broadcast %cst_13 : f32 to vector<2x4x16xf32>
    %31 = arith.maximumf %29, %30 : vector<2x4x16xf32>
    %c0_14 = arith.constant 0 : index
    %c0_15 = arith.constant 0 : index
    %c0_16 = arith.constant 0 : index
    %32 = vector.load %arg4[%c0_14, %c0_15, %c0_16] : memref<2x4x16xf32, #tpu.memory_space<vmem>>, vector<2x4x16xf32>
    tpu.vector_store %arg4[%c0_14, %c0_15, %c0_16], %31 {strides = array<i32>} : memref<2x4x16xf32, #tpu.memory_space<vmem>>, vector<2x4x16xf32>,
    return
  }
  func.func @transform_0(%arg0: i32) -> (i32, i32, i32) {
    %c0_i32 = arith.constant 0 : i32
    %c0_i32_0 = arith.constant 0 : i32
    %c0_i32_1 = arith.constant 0 : i32
    return %c0_i32, %arg0, %c0_i32_0 : i32, i32, i32
  }
  func.func @transform_1(%arg0: i32) -> (i32, i32) {
    %c0_i32 = arith.constant 0 : i32
    %c0_i32_0 = arith.constant 0 : i32
    return %arg0, %c0_i32 : i32, i32
  }
  func.func @transform_2(%arg0: i32) -> (i32, i32) {
    %c0_i32 = arith.constant 0 : i32
    %c0_i32_0 = arith.constant 0 : i32
    return %arg0, %c0_i32 : i32, i32
  }
  func.func @transform_3(%arg0: i32) -> (i32, i32, i32) {
    %c0_i32 = arith.constant 0 : i32
    %c0_i32_0 = arith.constant 0 : i32
    %c0_i32_1 = arith.constant 0 : i32
    return %c0_i32, %arg0, %c0_i32_0 : i32, i32, i32
  }
}

</mosaic_0001>

<bundles_post_ra>
// kernel: tpu_custom_call.1
= control target key start
LH: loop header
LB: loop body
LE: loop exit
PB: predicated region body
PF: predicated region fallthrough
CT: control target
= control target key end

     0   :  { %vm17_vm0 = vcmask 125952   ;;  %s160_s0 = inlined_call_operand.vmem [shape: f32[2,4,16], index: 0, kind: input, shape index: {}]   ;;  %s161_s1 = inlined_call_operand.vmem [shape: f32[4,1], index: 1, kind: input, shape index: {}]   ;;  %s162_s2 = inlined_call_operand.vmem [shape: f32[4,1], index: 2, kind: input, shape index: {}]   ;;  %s163_s3 = inlined_call_operand.hbm [shape: f32[2,4,16], index: 3, kind: output, shape index: {}]  }
   0x1   :  { %v15_v0 = vld [vmem:[%s160_s0] sm:$0xf]  ;;  %v16_v1 = vld [vmem:[%s160_s0 + $0x4] sm:$0xf] }
   0x2   :  { %v18_v2 = vsel %vm17_vm0, %v15_v0, 0.0  ;;  %v28_v3 = vmul.f32 %v15_v0, %v15_v0  ;;  %v29_v4 = vmul.f32 %v16_v1, %v16_v1 }
   0x3   :  { %8 = vsyncpa [#allocation3], 0  ;;  %19 = vadd.xlane.f32.xlu0 %v18_v2  ;;  %v21_v6 = vsel %vm17_vm0, %v16_v1, 0.0  ;;  %v115_v8 = vmov 0   ;;  %vm24_vm1 = vcmask 1043456   ;;  %s116_s19 = smov [#allocation2]  }
   0x4   :  { %v30_v5 = vsel %vm17_vm0, %v28_v3, 0.0  ;;  %v33_v7 = vsel %vm17_vm0, %v29_v4, 0.0  ;;  %89 = vset.pattern.permute.xlu0 %v115_v8  ;;  %90 = vset.pattern.permute.xlu1 %v115_v8  ;;  %v46_v25 = vld [vmem:[%s161_s1] sm:$0xf]  ;;  %s74_s20 = sshll.u32 %s116_s19, 4  ;;  %s75_s20 = int_to_ptr.vmem [resolvable:$true] %s74_s20 }
   0x5   :  { %31 = vadd.xlane.f32.xlu1 %v30_v5  ;;  %v48_v28 = vld [vmem:[%s162_s2] sm:$0xf]  ;;  %s93_s1 = scalar_lea.vmem %s75_s20, 128  ;;  %p98_p1 = scmp.lt.s32.totalorder %s75_s20, %s75_s20 }
   0x6   :  { %p94_p0 = scmp.ne.s32.totalorder %s75_s20, %s93_s1  ;;  %p99_p2 = scmp.lt.s32.totalorder %s93_s1, %s93_s1 }
   0x7   :  { %22 = vadd.xlane.f32.xlu0 %v21_v6 }
   0x8   :  { %p100_p3 = por %p99_p2, %p98_p1 }
   0x9   :  { %34 = vadd.xlane.f32.xlu1 %v33_v7 }
   0xa   :  { %p101_p4 = pnand %p100_p3, %p94_p0 }
  0x8c   :  { %v20_v9 = vpop.xlane.xlu0 %19 }
  0x8d   :  { %v25_v12 = vsel %vm24_vm1, %v20_v9, 0.0 }
  0x8e   :  { %v32_v10 = vpop.xlane.xlu1 %31 }
  0x8f   :  { %v36_v16 = vsel %vm24_vm1, %v32_v10, 0.0 }
  0x90   :  { %v23_v11 = vpop.xlane.xlu0 %22 }
  0x91   :  { %v26_v13 = vsel %vm24_vm1, %v23_v11, 0.0 }
  0x92   :  { %v27_v14 = vadd.f32 %v26_v13, %v25_v12  ;;  %v35_v15 = vpop.xlane.xlu1 %34 }
  0x93   :  { %v37_v17 = vsel %vm24_vm1, %v35_v15, 0.0 }
  0x94   :  { %v39_v18 = vmul.f32 0.03125, %v27_v14  ;;  %v38_v19 = vadd.f32 %v37_v17, %v36_v16 }
  0x96   :  { %v41_v20 = vmul.f32 %v39_v18, %v39_v18  ;;  %v40_v21 = vmul.f32 0.03125, %v38_v19 }
  0x98   :  { %v42_v22 = vsub.f32 %v40_v21, %v41_v20 }
  0x9a   :  { %v43_v23 = vmax.f32 %v42_v22, 0.0 }
  0x9c   :  { %v44_v24 = vadd.f32 1e-05, %v43_v23 }
  0x9e   :  { %91 = vrsqrt.f32 %v44_v24 }
  0xab   :  { %v92_v26 = vpop.eup %91 }
  0xac   :  { %v47_v27 = vmul.f32 %v92_v26, %v46_v25 }
  0xae   :  { %53 = vperm.xlu0 %89, %v47_v27   ;;  %v49_v29 = vmul.f32 %v47_v27, %v39_v18 }
  0xb0   :  { %v50_v30 = vsub.f32 %v48_v28, %v49_v29 }
  0xb2   :  { %60 = vperm.xlu1 %90, %v50_v30  }
 0x129   :  { %v54_v31 = vpop.permute.xlu0 %53 }
 0x12a   :  { %v56_v32 = vmul.f32 %v54_v31, %v15_v0  ;;  %v57_v33 = vmul.f32 %v54_v31, %v16_v1 }
 0x12d   :  { %v61_v34 = vpop.permute.xlu1 %60 }
 0x12e   :  { %v63_v35 = vadd.f32 %v61_v34, %v56_v32  ;;  %v64_v36 = vadd.f32 %v61_v34, %v57_v33 }
 0x130   :  { %v65_v37 = vmax.f32 %v63_v35, 0.0  ;;  %v66_v38 = vmax.f32 %v64_v36, 0.0 }
 0x132   :  { %67 = vst.msk [vmem:[#allocation2] sm:$0xf] %vm17_vm0, %v65_v37  ;;  %68 = vst.msk [vmem:[#allocation2 + $0x4] sm:$0xf] %vm17_vm0, %v66_v38 }
 0x133   :  { %104 = shalt.err (!%p101_p4)
}
 0x134   :  { %s117_s2 = smov 64   ;;  %s118_s21 = smov 4  }
 0x135   :  { %80 = dma.vmem_to_hbm [thread:$0]  %s75_s20, 128, %s163_s3, [#allocation3], %s117_s2, %s117_s2, %s118_s21  }
 0x136   :  { %113 = dma.done.wait [#allocation3], 128  }
 0x137   :  { %114 = vsyncadd [#allocation3], 4294967168 }
 0x138   :  { %84 = vsyncpa [#allocation3], 1 }

</bundles_post_ra>
